<compile_context>
chip_gen: v6e
topology: v6e:2x2x1
jax: 0.10.0
libtpu: 0.0.40
codegen_flags: <defaults>
</compile_context>

<pallas_src>
import jax
import jax.numpy as jnp
from jax.experimental import pallas as pl
from jax.experimental.pallas import tpu as pltpu


def _copy_kernel(x_ref, o_ref):
    # One grid step moves one (row_tile, lanes) block HBM -> VMEM -> HBM.
    o_ref[...] = x_ref[...]


# Lane widths to try for the flattened slab, all multiples of 128
# (largest first for lane-dense, long unmasked stores).
_LANE_CANDIDATES = (2048, 1024, 512, 256, 128)


def _sublane_multiple(dtype) -> int:
    """Minimum row-tile granularity so packed dtypes fill whole sublanes."""
    itemsize = jnp.dtype(dtype).itemsize
    return {4: 8, 2: 16, 1: 32}.get(itemsize, 8)


def _vmem_capacity_bytes() -> int:
    """Trace-time VMEM capacity query with a conservative (v7x) fallback."""
    try:
        info = pltpu.get_tpu_info()
        cap = getattr(info, "vmem_capacity_bytes", None)
        if cap:
            return int(cap)
    except Exception:
        pass
    return 64 * 1024 * 1024  # v7x-sized fallback: safe everywhere


def _choose_lanes(total: int):
    """Largest lane candidate (multiple of 128) that divides `total`."""
    for lanes in _LANE_CANDIDATES:
        if total % lanes == 0:
            return lanes
    return None


def _choose_row_tile(slab_rows: int, lanes: int, itemsize: int, sub: int,
                     block_bytes_budget: int) -> int:
    """Sublane-aligned row tile that (a) fits the per-block byte budget,
    (b) leaves the grid with >= 2 steps when possible (v7x megacore), and
    (c) prefers a divisor of slab_rows (no ragged tail) but never falls back
    to an oversized full-slab block."""
    if slab_rows <= sub:
        # Full-extent second-to-last dim is always a legal block shape.
        return slab_rows

    # (a) budget cap, sublane-aligned.
    budget_rows = max(sub, (block_bytes_budget // (lanes * itemsize)) // sub * sub)

    # (b) make sure there are at least 2 grid steps when the slab allows it.
    if slab_rows >= 2 * sub:
        steps_cap = max(sub, (pl.cdiv(slab_rows, 2) // sub) * sub)
    else:
        steps_cap = slab_rows

    tile = min(budget_rows, steps_cap)
    tile = max(sub, (tile // sub) * sub)

    # (c) prefer an aligned divisor at or below `tile` (bounded trace-time scan).
    d = tile
    while d >= sub:
        if slab_rows % d == 0:
            return d
        d -= sub
    # No aligned divisor within budget: keep the budget-capped tile and use a
    # cdiv grid; Pallas pads/masks the ragged final block.
    return tile


def view_pallas(x, o: int):
    """Equivalent of torch.Tensor.view(-1, o), executed through a Pallas kernel."""
    total = int(x.size)
    assert total % o == 0, f"cannot view size {total} as (-1, {o})"
    rows_out = total // o

    dtype = x.dtype
    itemsize = jnp.dtype(dtype).itemsize
    sub = _sublane_multiple(dtype)

    # Per-generation budgets derived from VMEM capacity:
    #   v7x  (64 MiB VMEM)  -> ~4 MiB blocks, 48 MiB scoped limit
    #   v5e/v6e (128 MiB)   -> ~6 MiB blocks, 64 MiB scoped limit
    vmem_cap = _vmem_capacity_bytes()
    block_bytes_budget = min(6 * 1024 * 1024, max(2 * 1024 * 1024, vmem_cap // 16))
    vmem_limit = int(min(64 * 1024 * 1024, max(32 * 1024 * 1024, (vmem_cap * 3) // 4)))

    # Flatten (pure metadata for a contiguous array) and, if the element count
    # has no factor of 128, pad up to a 128 multiple so the slab stays
    # lane-dense (no masked partial stores inside the kernel).
    flat = jnp.ravel(x)
    lanes = _choose_lanes(total)
    if lanes is None:
        padded_total = ((total + 127) // 128) * 128
        flat = jnp.pad(flat, (0, padded_total - total))
        lanes = _choose_lanes(padded_total)  # 128 always divides now
    else:
        padded_total = total
    slab_rows = padded_total // lanes

    row_tile = _choose_row_tile(slab_rows, lanes, itemsize, sub, block_bytes_budget)
    grid = (pl.cdiv(slab_rows, row_tile),)

    x2d = jnp.reshape(flat, (slab_rows, lanes))

    y2d = pl.pallas_call(
        _copy_kernel,
        out_shape=jax.ShapeDtypeStruct((slab_rows, lanes), dtype),
        grid=grid,
        in_specs=[pl.BlockSpec((row_tile, lanes), lambda i: (i, 0))],
        out_specs=pl.BlockSpec((row_tile, lanes), lambda i: (i, 0)),
        compiler_params=pltpu.CompilerParams(
            dimension_semantics=("parallel",),
            vmem_limit_bytes=vmem_limit,
        ),
        cost_estimate=pl.CostEstimate(
            flops=0,
            transcendentals=0,
            bytes_accessed=2 * padded_total * itemsize,
        ),
    )(x2d)

    # Drop any lane padding and apply the final (-1, o) shape (pure metadata).
    y_flat = jnp.reshape(y2d, (padded_total,))
    if padded_total != total:
        y_flat = y_flat[:total]
    return jnp.reshape(y_flat, (rows_out, o))


if __name__ == "__main__":
    key = jax.random.PRNGKey(0)

    # Small input consistent with a typical NCHW activation: (2, 4, 16, 16).
    x = jax.random.normal(key, (2, 4, 16, 16), dtype=jnp.float32)

    o = 32  # target last-dim of the view, as in View(o=32)
    y = view_pallas(x, o)
    y = jax.block_until_ready(y)

    # Correctness check against the pure-JAX reshape (== torch .view semantics).
    y_ref = jnp.reshape(x, (-1, o))
    assert y.shape == y_ref.shape, (y.shape, y_ref.shape)
    assert y.dtype == y_ref.dtype
    assert bool(jnp.array_equal(y, y_ref))

    print("KERNEL_OK")
</pallas_src>

<mosaic_0001>
module attributes {stable_mosaic.version = 11 : i64} {
  func.func @_copy_kernel(%arg0: i32, %arg1: memref<1x2048xf32, #tpu.memory_space<vmem>>, %arg2: memref<1x2048xf32, #tpu.memory_space<vmem>>) attributes {dimension_semantics = [#tpu.dimension_semantics<parallel>], iteration_bounds = array<i64: 1>, scalar_prefetch = 0 : i64, scratch_operands = 0 : i64, tpu.core_type = #tpu.core_type<tc>, window_params = [{transform_indices = @transform_0, window_bounds = array<i64: 1, 2048>}, {transform_indices = @transform_1, window_bounds = array<i64: 1, 2048>}]} {
    %c0 = arith.constant 0 : index
    %c0_0 = arith.constant 0 : index
    %0 = vector.load %arg1[%c0, %c0_0] : memref<1x2048xf32, #tpu.memory_space<vmem>>, vector<1x2048xf32>
    %c0_1 = arith.constant 0 : index
    %c0_2 = arith.constant 0 : index
    %1 = vector.load %arg2[%c0_1, %c0_2] : memref<1x2048xf32, #tpu.memory_space<vmem>>, vector<1x2048xf32>
    tpu.vector_store %arg2[%c0_1, %c0_2], %0 {strides = array<i32>} : memref<1x2048xf32, #tpu.memory_space<vmem>>, vector<1x2048xf32>,
    return
  }
  func.func @transform_0(%arg0: i32) -> (i32, i32) {
    %c0_i32 = arith.constant 0 : i32
    %c0_i32_0 = arith.constant 0 : i32
    return %arg0, %c0_i32 : i32, i32
  }
  func.func @transform_1(%arg0: i32) -> (i32, i32) {
    %c0_i32 = arith.constant 0 : i32
    %c0_i32_0 = arith.constant 0 : i32
    return %arg0, %c0_i32 : i32, i32
  }
}

</mosaic_0001>

<bundles_post_ra>
// kernel: tpu_custom_call.1
= control target key start
LH: loop header
LB: loop body
LE: loop exit
PB: predicated region body
PF: predicated region fallthrough
CT: control target
= control target key end

     0   :  { %6 = vsyncpa [#allocation3], 0  ;;  %s104_s0 = inlined_call_operand.hbm [shape: f32[1,2048], index: 0, kind: input, shape index: {}]   ;;  %s105_s1 = inlined_call_operand.hbm [shape: f32[1,2048], index: 1, kind: output, shape index: {}]  }
   0x1   :  { %7 = vsyncpa [#allocation4], 0  ;;  %s86_s6 = smov [#allocation2]  }
   0x2   :  { %s14_s7 = sshll.u32 %s86_s6, 4  ;;  %s15_s7 = int_to_ptr.vmem [resolvable:$true] %s14_s7 }
   0x3   :  { %s50_s8 = scalar_lea.vmem %s15_s7, 256  ;;  %p55_p1 = scmp.lt.s32.totalorder %s15_s7, %s15_s7 }
   0x4   :  { %p51_p0 = scmp.ne.s32.totalorder %s15_s7, %s50_s8  ;;  %p56_p2 = scmp.lt.s32.totalorder %s50_s8, %s50_s8 }
   0x6   :  { %p57_p3 = por %p56_p2, %p55_p1 }
   0x8   :  { %p58_p4 = pnand %p57_p3, %p51_p0 }
   0xa   :  { %61 = shalt.err (!%p58_p4)
}
   0xb   :  { %17 = dma.hbm_to_vmem [thread:$0]  %s104_s0, 256, %s15_s7, [#allocation3]  }
   0xc   :  { %82 = dma.done.wait [#allocation3], 256  }
   0xd   :  { %83 = vsyncadd [#allocation3], 4294967040  ;;  %s87_s11 = smov [#allocation5]   ;;  %v21_v0 = vld [vmem:[#allocation2] sm:$0xff]  ;;  %v22_v1 = vld [vmem:[#allocation2 + $0x8] sm:$0xff] }
   0xe   :  { %s31_s12 = sshll.u32 %s87_s11, 4  ;;  %23 = vst [vmem:[#allocation5] sm:$0xff] %v21_v0  ;;  %24 = vst [vmem:[#allocation5 + $0x8] sm:$0xff] %v22_v1  ;;  %s32_s12 = int_to_ptr.vmem [resolvable:$true] %s31_s12 }
   0xf   :  { %s62_s13 = scalar_lea.vmem %s32_s12, 256  ;;  %p67_p6 = scmp.lt.s32.totalorder %s32_s12, %s32_s12 }
  0x10   :  { %p63_p5 = scmp.ne.s32.totalorder %s32_s12, %s62_s13  ;;  %p68_p7 = scmp.lt.s32.totalorder %s62_s13, %s62_s13 }
  0x12   :  { %p69_p8 = por %p68_p7, %p67_p6 }
  0x14   :  { %p70_p9 = pnand %p69_p8, %p63_p5 }
  0x16   :  { %73 = shalt.err (!%p70_p9)
}
  0x17   :  { %34 = dma.vmem_to_hbm [thread:$0]  %s32_s12, 256, %s105_s1, [#allocation4]  }
  0x18   :  { %84 = dma.done.wait [#allocation4], 256  }
  0x19   :  { %85 = vsyncadd [#allocation4], 4294967040 }
  0x1a   :  { %38 = vsyncpa [#allocation3], 1 }
  0x1b   :  { %39 = vsyncpa [#allocation4], 1 }

</bundles_post_ra>
